<compile_context>
chip_gen: v5e
topology: v5e:2x2
jax: 0.10.0
libtpu: 0.0.40
codegen_flags: <defaults>
</compile_context>

<pallas_src>
import jax
import jax.numpy as jnp
from jax.experimental import pallas as pl
from jax.experimental.pallas import tpu as pltpu

NEG_SLOPE = 0.01      # F.leaky_relu default negative_slope
HIDDEN = 100          # nn.Linear(x_dim, 100)
HIDDEN_PAD = 128      # lane-dense padded hidden width
LANE = 128
MAX_BATCH_TILE = 512  # batch rows per grid step (well under VMEM on all gens)


def _round_up(n, m):
    return (n + m - 1) // m * m


def _leaky_relu(v):
    return jnp.where(v > 0, v, NEG_SLOPE * v)


def x_mlp_kernel(x_ref, w1_ref, b1_ref, w2_ref, b2_ref, out_ref):
    # layer 1: (TB, x_dim) @ (x_dim, 128) + (1, 128); hidden padded 100->128
    h = jnp.dot(x_ref[...], w1_ref[...], preferred_element_type=jnp.float32)
    h = _leaky_relu(h + b1_ref[...])
    # layer 2: (TB, 128) @ (128, z_pad) + (1, z_pad); z padded to lane multiple
    o = jnp.dot(h, w2_ref[...], preferred_element_type=jnp.float32)
    out_ref[...] = _leaky_relu(o + b2_ref[...])


class XModuleParams:
    """Parameters matching nn.Linear init U(-1/sqrt(in), 1/sqrt(in)).

    Stored transposed ((in, out)) and zero-padded to lane-dense widths for the
    kernel; the raw (unpadded) copies are kept only for the reference check.
    """

    def __init__(self, key, x_dim, z_dim):
        self.x_dim = x_dim
        self.z_dim = z_dim
        self.z_pad = _round_up(z_dim, LANE)

        k1w, k1b, k2w, k2b = jax.random.split(key, 4)
        bound1 = 1.0 / jnp.sqrt(jnp.float32(x_dim))
        w1 = jax.random.uniform(k1w, (x_dim, HIDDEN), jnp.float32, -bound1, bound1)
        b1 = jax.random.uniform(k1b, (1, HIDDEN), jnp.float32, -bound1, bound1)
        bound2 = 1.0 / jnp.sqrt(jnp.float32(HIDDEN))
        w2 = jax.random.uniform(k2w, (HIDDEN, z_dim), jnp.float32, -bound2, bound2)
        b2 = jax.random.uniform(k2b, (1, z_dim), jnp.float32, -bound2, bound2)

        # raw copies for the pure-JAX reference
        self.w1_raw, self.b1_raw, self.w2_raw, self.b2_raw = w1, b1, w2, b2

        # zero-pad: extra hidden units produce 0 (0 weight, 0 bias -> lrelu 0)
        # and contribute nothing through the zero rows of w2; extra z lanes are
        # sliced off in the wrapper.
        self.w1 = jnp.pad(w1, ((0, 0), (0, HIDDEN_PAD - HIDDEN)))
        self.b1 = jnp.pad(b1, ((0, 0), (0, HIDDEN_PAD - HIDDEN)))
        self.w2 = jnp.pad(w2, ((0, HIDDEN_PAD - HIDDEN), (0, self.z_pad - z_dim)))
        self.b2 = jnp.pad(b2, ((0, 0), (0, self.z_pad - z_dim)))


def x_module_forward(params, x):
    """Equivalent of X_module.forward(x) -> (B, z_dim)."""
    B, x_dim = x.shape
    z_pad = params.z_pad

    # batch blocking: pad B to a sublane multiple and tile the batch axis
    B_pad = _round_up(B, 8)
    TB = B_pad if B_pad <= MAX_BATCH_TILE else MAX_BATCH_TILE
    B_pad = _round_up(B_pad, TB)
    if B_pad != B:
        x = jnp.pad(x, ((0, B_pad - B), (0, 0)))

    grid = (B_pad // TB,)

    out = pl.pallas_call(
        x_mlp_kernel,
        out_shape=jax.ShapeDtypeStruct((B_pad, z_pad), jnp.float32),
        grid=grid,
        in_specs=[
            pl.BlockSpec((TB, x_dim), lambda i: (i, 0)),            # x tile
            pl.BlockSpec((x_dim, HIDDEN_PAD), lambda i: (0, 0)),    # w1 (resident)
            pl.BlockSpec((1, HIDDEN_PAD), lambda i: (0, 0)),        # b1 (resident)
            pl.BlockSpec((HIDDEN_PAD, z_pad), lambda i: (0, 0)),    # w2 (resident)
            pl.BlockSpec((1, z_pad), lambda i: (0, 0)),             # b2 (resident)
        ],
        out_specs=pl.BlockSpec((TB, z_pad), lambda i: (i, 0)),
        compiler_params=pltpu.CompilerParams(
            dimension_semantics=("parallel",)),
    )(x, params.w1, params.b1, params.w2, params.b2)

    return out[:B, :params.z_dim]


if __name__ == "__main__":
    # Small shapes consistent with the module: x is (B, x_dim) covariates.
    B, X_DIM, Z_DIM = 8, 16, 32

    key = jax.random.PRNGKey(0)
    k_params, k_x = jax.random.split(key)

    params = XModuleParams(k_params, X_DIM, Z_DIM)
    x = jax.random.normal(k_x, (B, X_DIM), jnp.float32)

    x_out = x_module_forward(params, x)
    jax.block_until_ready(x_out)

    assert x_out.shape == (B, Z_DIM), x_out.shape

    # Pure-JAX reference check (unpadded weights).
    def ref_mlp(a, w1, b1, w2, b2):
        h = a @ w1 + b1
        h = jnp.where(h > 0, h, NEG_SLOPE * h)
        o = h @ w2 + b2
        return jnp.where(o > 0, o, NEG_SLOPE * o)

    ref = ref_mlp(x, params.w1_raw, params.b1_raw, params.w2_raw, params.b2_raw)
    assert jnp.allclose(x_out, ref, atol=1e-5, rtol=1e-5)

    # Also exercise a batch larger than one tile to check the grid path.
    B2 = 1030
    x2 = jax.random.normal(jax.random.PRNGKey(7), (B2, X_DIM), jnp.float32)
    out2 = x_module_forward(params, x2)
    jax.block_until_ready(out2)
    ref2 = ref_mlp(x2, params.w1_raw, params.b1_raw, params.w2_raw, params.b2_raw)
    assert out2.shape == (B2, Z_DIM)
    assert jnp.allclose(out2, ref2, atol=1e-5, rtol=1e-5)

    print("KERNEL_OK")
</pallas_src>

<mosaic_0001>
module attributes {stable_mosaic.version = 11 : i64} {
  func.func @x_mlp_kernel(%arg0: i32, %arg1: memref<8x16xf32, #tpu.memory_space<vmem>>, %arg2: memref<16x128xf32, #tpu.memory_space<vmem>>, %arg3: memref<1x128xf32, #tpu.memory_space<vmem>>, %arg4: memref<128x128xf32, #tpu.memory_space<vmem>>, %arg5: memref<1x128xf32, #tpu.memory_space<vmem>>, %arg6: memref<8x128xf32, #tpu.memory_space<vmem>>) attributes {dimension_semantics = [#tpu.dimension_semantics<parallel>], iteration_bounds = array<i64: 1>, scalar_prefetch = 0 : i64, scratch_operands = 0 : i64, tpu.core_type = #tpu.core_type<tc>, window_params = [{transform_indices = @transform_0, window_bounds = array<i64: 8, 16>}, {pipeline_mode = #tpu.pipeline_mode<synchronous>, transform_indices = @transform_1, window_bounds = array<i64: 16, 128>}, {pipeline_mode = #tpu.pipeline_mode<synchronous>, transform_indices = @transform_2, window_bounds = array<i64: 1, 128>}, {pipeline_mode = #tpu.pipeline_mode<synchronous>, transform_indices = @transform_3, window_bounds = array<i64: 128, 128>}, {pipeline_mode = #tpu.pipeline_mode<synchronous>, transform_indices = @transform_4, window_bounds = array<i64: 1, 128>}, {transform_indices = @transform_5, window_bounds = array<i64: 8, 128>}]} {
    %c0 = arith.constant 0 : index
    %c0_0 = arith.constant 0 : index
    %0 = vector.load %arg1[%c0, %c0_0] : memref<8x16xf32, #tpu.memory_space<vmem>>, vector<8x16xf32>
    %c0_1 = arith.constant 0 : index
    %c0_2 = arith.constant 0 : index
    %1 = vector.load %arg2[%c0_1, %c0_2] : memref<16x128xf32, #tpu.memory_space<vmem>>, vector<16x128xf32>
    %cst = arith.constant dense<0.000000e+00> : vector<8x128xf32>
    %2 = tpu.matmul %0, %1, %cst {dimension_numbers = #tpu.dot_dimension_numbers<[1], [0], [0], [1], [0, 0, 1, 1], [], []>} : vector<8x16xf32>, vector<16x128xf32>, vector<8x128xf32> -> vector<8x128xf32>
    %c0_3 = arith.constant 0 : index
    %c0_4 = arith.constant 0 : index
    %3 = vector.load %arg3[%c0_3, %c0_4] : memref<1x128xf32, #tpu.memory_space<vmem>>, vector<1x128xf32>
    %4 = vector.broadcast %3 : vector<1x128xf32> to vector<8x128xf32>
    %5 = arith.addf %2, %4 : vector<8x128xf32>
    %cst_5 = arith.constant 0.000000e+00 : f32
    %6 = vector.broadcast %cst_5 : f32 to vector<8x128xf32>
    %7 = arith.cmpf ogt, %5, %6 : vector<8x128xf32>
    %cst_6 = arith.constant 0.00999999977 : f32
    %8 = vector.broadcast %cst_6 : f32 to vector<8x128xf32>
    %9 = arith.mulf %8, %5 : vector<8x128xf32>
    %10 = arith.select %7, %5, %9 : vector<8x128xi1>, vector<8x128xf32>
    %c0_7 = arith.constant 0 : index
    %c0_8 = arith.constant 0 : index
    %11 = vector.load %arg4[%c0_7, %c0_8] : memref<128x128xf32, #tpu.memory_space<vmem>>, vector<128x128xf32>
    %cst_9 = arith.constant dense<0.000000e+00> : vector<8x128xf32>
    %12 = tpu.matmul %10, %11, %cst_9 {dimension_numbers = #tpu.dot_dimension_numbers<[1], [0], [0], [1], [0, 0, 1, 1], [], []>} : vector<8x128xf32>, vector<128x128xf32>, vector<8x128xf32> -> vector<8x128xf32>
    %c0_10 = arith.constant 0 : index
    %c0_11 = arith.constant 0 : index
    %13 = vector.load %arg5[%c0_10, %c0_11] : memref<1x128xf32, #tpu.memory_space<vmem>>, vector<1x128xf32>
    %14 = vector.broadcast %13 : vector<1x128xf32> to vector<8x128xf32>
    %15 = arith.addf %12, %14 : vector<8x128xf32>
    %cst_12 = arith.constant 0.000000e+00 : f32
    %16 = vector.broadcast %cst_12 : f32 to vector<8x128xf32>
    %17 = arith.cmpf ogt, %15, %16 : vector<8x128xf32>
    %cst_13 = arith.constant 0.00999999977 : f32
    %18 = vector.broadcast %cst_13 : f32 to vector<8x128xf32>
    %19 = arith.mulf %18, %15 : vector<8x128xf32>
    %20 = arith.select %17, %15, %19 : vector<8x128xi1>, vector<8x128xf32>
    %c0_14 = arith.constant 0 : index
    %c0_15 = arith.constant 0 : index
    %21 = vector.load %arg6[%c0_14, %c0_15] : memref<8x128xf32, #tpu.memory_space<vmem>>, vector<8x128xf32>
    tpu.vector_store %arg6[%c0_14, %c0_15], %20 {strides = array<i32>} : memref<8x128xf32, #tpu.memory_space<vmem>>, vector<8x128xf32>,
    return
  }
  func.func @transform_0(%arg0: i32) -> (i32, i32) {
    %c0_i32 = arith.constant 0 : i32
    %c0_i32_0 = arith.constant 0 : i32
    return %arg0, %c0_i32 : i32, i32
  }
  func.func @transform_1(%arg0: i32) -> (i32, i32) {
    %c0_i32 = arith.constant 0 : i32
    %c0_i32_0 = arith.constant 0 : i32
    %c0_i32_1 = arith.constant 0 : i32
    return %c0_i32, %c0_i32_0 : i32, i32
  }
  func.func @transform_2(%arg0: i32) -> (i32, i32) {
    %c0_i32 = arith.constant 0 : i32
    %c0_i32_0 = arith.constant 0 : i32
    %c0_i32_1 = arith.constant 0 : i32
    return %c0_i32, %c0_i32_0 : i32, i32
  }
  func.func @transform_3(%arg0: i32) -> (i32, i32) {
    %c0_i32 = arith.constant 0 : i32
    %c0_i32_0 = arith.constant 0 : i32
    %c0_i32_1 = arith.constant 0 : i32
    return %c0_i32, %c0_i32_0 : i32, i32
  }
  func.func @transform_4(%arg0: i32) -> (i32, i32) {
    %c0_i32 = arith.constant 0 : i32
    %c0_i32_0 = arith.constant 0 : i32
    %c0_i32_1 = arith.constant 0 : i32
    return %c0_i32, %c0_i32_0 : i32, i32
  }
  func.func @transform_5(%arg0: i32) -> (i32, i32) {
    %c0_i32 = arith.constant 0 : i32
    %c0_i32_0 = arith.constant 0 : i32
    return %arg0, %c0_i32 : i32, i32
  }
}

</mosaic_0001>

<bundles_post_ra>
// kernel: tpu_custom_call.1
= control target key start
LH: loop header
LB: loop body
LE: loop exit
PB: predicated region body
PF: predicated region fallthrough
CT: control target
= control target key end

     0   :  { %10 = vsyncpa [#allocation3], 0  ;;  %s327_s0 = inlined_call_operand.hbm [shape: f32[8,16], index: 0, kind: input, shape index: {}]   ;;  %s328_s1 = inlined_call_operand.hbm [shape: f32[16,128], index: 1, kind: input, shape index: {}]   ;;  %s329_s2 = inlined_call_operand.vmem [shape: f32[1,128], index: 2, kind: input, shape index: {}]   ;;  %s330_s3 = inlined_call_operand.hbm [shape: f32[128,128], index: 3, kind: input, shape index: {}]   ;;  %s331_s4 = inlined_call_operand.vmem [shape: f32[1,128], index: 4, kind: input, shape index: {}]   ;;  %s332_s5 = inlined_call_operand.hbm [shape: f32[8,128], index: 5, kind: output, shape index: {}]  }
   0x1   :  { %11 = vsyncpa [#allocation6], 0  ;;  %s28_s20 = sshll.u32 %s328_s1, 4  ;;  %s29_s20 = int_to_ptr.hbm [resolvable:$true] %s28_s20 }
   0x2   :  { %12 = vsyncpa [#allocation4], 0  ;;  %s273_s21 = smov [#allocation5]   ;;  %s18_s25 = sshll.u32 %s327_s0, 4  ;;  %s19_s25 = int_to_ptr.hbm [resolvable:$true] %s18_s25 }
   0x3   :  { %s30_s22 = sshll.u32 %s273_s21, 4  ;;  %s274_s26 = smov 128   ;;  %s31_s22 = int_to_ptr.vmem [resolvable:$true] %s30_s22 }
   0x4   :  { %s275_s27 = smov 8   ;;  %s276_s28 = smov [#allocation2]  }
   0x5   :  { %36 = dma.hbm_to_vmem [thread:$0]  %s29_s20, 256, %s31_s22, [#allocation6], %s274_s26, %s274_s26, %s275_s27  }
   0x6   :  { %s20_s29 = sshll.u32 %s276_s28, 4  ;;  %s43_s7 = sshll.u32 %s330_s3, 4  ;;  %s21_s29 = int_to_ptr.vmem [resolvable:$true] %s20_s29  ;;  %s44_s7 = int_to_ptr.hbm [resolvable:$true] %s43_s7 }
   0x7   :  { %23 = dma.hbm_to_vmem [thread:$0]  %s19_s25, 128, %s21_s29, [#allocation3]  }
   0x8   :  { %s277_s1 = smov [#allocation7]  }
   0x9   :  { %s45_s8 = sshll.u32 %s277_s1, 4  ;;  %s46_s8 = int_to_ptr.vmem [resolvable:$true] %s45_s8 }
   0xa   :  { %51 = dma.hbm_to_vmem [thread:$0]  %s44_s7, 2048, %s46_s8, [#allocation6], %s274_s26, %s274_s26, %s275_s27  }
   0xb   :  { %267 = dma.done.wait [#allocation3], 128  }
   0xc   :  { %268 = vsyncadd [#allocation3], 4294967168 }
   0xd   :  { %269 = dma.done.wait [#allocation6], 2304  }
   0xe   :  { %270 = vsyncadd [#allocation6], 4294964992  ;;  %v68_v0 = vld [vmem:[#allocation5 + $0x8] sm:$0xff]  ;;  %v67_v1 = vld [vmem:[#allocation5] sm:$0xff]  ;;  %vm73_vm0 = vcmask 130048   ;;  %s278_s11 = smov [#allocation8]  }
   0xf   :  { %91 = vmatpush.msra.mxu0 %v68_v0  ;;  %v66_v2 = vld [vmem:[#allocation2] sm:$0xff]  ;;  %v115_v3 = vld [vmem:[#allocation7 + $0x78] sm:$0xff]  ;;  %v114_v4 = vld [vmem:[#allocation7 + $0x70] sm:$0xff]  ;;  %s149_s12 = sshll.u32 %s278_s11, 4  ;;  %s151_s15 = sshll.u32 %s332_s5, 4  ;;  %s150_s12 = int_to_ptr.vmem [resolvable:$true] %s149_s12  ;;  %s152_s15 = int_to_ptr.hbm [resolvable:$true] %s151_s15 }
  0x10   :  { %120 = vmatpush.msra.mxu1 %v115_v3  ;;  %v113_v5 = vld [vmem:[#allocation7 + $0x68] sm:$0xff]  ;;  %v112_v6 = vld [vmem:[#allocation7 + $0x60] sm:$0xff]  ;;  %v111_v7 = vld [vmem:[#allocation7 + $0x58] sm:$0xff] }
  0x11   :  { %92 = vmatpush.msra.mxu0 %v67_v1  ;;  %v110_v8 = vld [vmem:[#allocation7 + $0x50] sm:$0xff]  ;;  %v109_v9 = vld [vmem:[#allocation7 + $0x48] sm:$0xff]  ;;  %v108_v10 = vld [vmem:[#allocation7 + $0x40] sm:$0xff] }
  0x12   :  { %162 = vmatmul.msk.f32.vlgmr.msra.gmra.mxu0 %vm73_vm0, %v66_v2  ;;  %121 = vmatpush.msra.mxu1 %v114_v4  ;;  %v107_v11 = vld [vmem:[#allocation7 + $0x38] sm:$0xff]  ;;  %v106_v12 = vld [vmem:[#allocation7 + $0x30] sm:$0xff]  ;;  %v105_v13 = vld [vmem:[#allocation7 + $0x28] sm:$0xff] }
  0x13   :  { %v104_v14 = vld [vmem:[#allocation7 + $0x20] sm:$0xff]  ;;  %v103_v15 = vld [vmem:[#allocation7 + $0x18] sm:$0xff]  ;;  %v102_v16 = vld [vmem:[#allocation7 + $0x10] sm:$0xff] }
  0x14   :  { %122 = vmatpush.msra.mxu1 %v113_v5  ;;  %v101_v17 = vld [vmem:[#allocation7 + $0x8] sm:$0xff]  ;;  %v100_v18 = vld [vmem:[#allocation7] sm:$0xff] }
  0x15   :  { %v169_v19 = vld [vmem:[%s329_s2] ss:$0 sm:$0xff] }
  0x16   :  { %123 = vmatpush.msra.mxu1 %v112_v6  ;;  %v170_v24 = vld [vmem:[%s331_s4] ss:$0 sm:$0xff] }
  0x18   :  { %124 = vmatpush.msra.mxu1 %v111_v7 }
  0x1a   :  { %125 = vmatpush.msra.mxu1 %v110_v8 }
  0x1c   :  { %126 = vmatpush.msra.mxu1 %v109_v9 }
  0x1e   :  { %127 = vmatpush.msra.mxu1 %v108_v10 }
  0x20   :  { %128 = vmatpush.msra.mxu1 %v107_v11 }
  0x22   :  { %129 = vmatpush.msra.mxu1 %v106_v12 }
  0x24   :  { %130 = vmatpush.msra.mxu1 %v105_v13 }
  0x26   :  { %131 = vmatpush.msra.mxu1 %v104_v14 }
  0x28   :  { %132 = vmatpush.msra.mxu1 %v103_v15 }
  0x2a   :  { %133 = vmatpush.msra.mxu1 %v102_v16 }
  0x2c   :  { %134 = vmatpush.msra.mxu1 %v101_v17 }
  0x2e   :  { %135 = vmatpush.msra.mxu1 %v100_v18 }
  0x8f   :  { %v94_v20 = vpop.f32.mrf.mxu0 }
  0x90   :  { %v95_v21 = vadd.f32 %v169_v19, %v94_v20 }
  0x92   :  { %vm97_vm1 = vcmp.gt.f32.partialorder %v95_v21, 0.0  ;;  %v98_v22 = vmul.f32 0.01, %v95_v21 }
  0x94   :  { %v99_v23 = vsel %vm97_vm1, %v95_v21, %v98_v22 }
  0x95   :  { %136 = vmatmul.f32.vlgmr.msra.gmra.mxu1 %v99_v23 }
 0x112   :  { %v137_v25 = vpop.f32.mrf.mxu1 }
 0x113   :  { %v138_v26 = vadd.f32 %v170_v24, %v137_v25 }
 0x115   :  { %vm140_vm2 = vcmp.gt.f32.partialorder %v138_v26, 0.0  ;;  %v141_v27 = vmul.f32 0.01, %v138_v26 }
 0x117   :  { %v142_v28 = vsel %vm140_vm2, %v138_v26, %v141_v27 }
 0x118   :  { %143 = vst [vmem:[#allocation8] sm:$0xff] %v142_v28 }
 0x119   :  { %154 = dma.vmem_to_hbm [thread:$0]  %s150_s12, 128, %s152_s15, [#allocation4]  }
 0x11a   :  { %271 = dma.done.wait [#allocation4], 128  }
 0x11b   :  { %272 = vsyncadd [#allocation4], 4294967168 }
 0x11c   :  { %159 = vsyncpa [#allocation3], 1 }
 0x11d   :  { %160 = vsyncpa [#allocation6], 1 }
 0x11e   :  { %161 = vsyncpa [#allocation4], 1 }

</bundles_post_ra>
